<compile_context>
chip_gen: v7x
topology: tpu7x:2x2x1
jax: 0.10.0
libtpu: 0.0.40
codegen_flags: <defaults>
</compile_context>

<pallas_src>
import jax
import jax.numpy as jnp
from jax.experimental import pallas as pl
from jax.experimental.pallas import tpu as pltpu

N_NODES = 5
LANES = 128
BLOCK_B = 8  # f32 sublane tile


def _rup(n, m):
    return ((n + m - 1) // m) * m


def _rup8(n):
    return _rup(n, 8)


def _layout(nf, nh, nh1):
    """Static row offsets of each constant section inside the packed (R, 128) slab."""
    offs = {}
    r = 0
    for name, rows in (
        ("m1", _rup8(nf)),    # kron(A_hat^T, W1)  (N*F, N*H)
        ("b1", 8),            # tiled bias 1       (1, N*H)
        ("m2", _rup8(nh)),    # kron(A_hat^T, W2)  (N*H, N*H1)
        ("b2", 8),            # tiled bias 2       (1, N*H1)
        ("w3", _rup8(nh1)),   # W3^T               (N*H1, C) padded to 128 lanes
        ("b3", 8),            # bias 3             (1, C) padded to 128 lanes
    ):
        offs[name] = r
        r += rows
    return offs, r


def _make_kernel(nf, nh, nh1, offs):
    r1, rb1 = offs["m1"], offs["b1"]
    r2, rb2 = offs["m2"], offs["b2"]
    r3, rb3 = offs["w3"], offs["b3"]

    def kernel(x_ref, p_ref, o_ref):
        x = x_ref[...]                            # (TB, N*F)  flattened node features
        m1 = p_ref[r1:r1 + nf, 0:nh]              # (N*F, N*H)
        b1 = p_ref[rb1:rb1 + 1, 0:nh]             # (1, N*H)
        m2 = p_ref[r2:r2 + nh, 0:nh1]             # (N*H, N*H1)
        b2 = p_ref[rb2:rb2 + 1, 0:nh1]            # (1, N*H1)
        w3 = p_ref[r3:r3 + nh1, :]                # (N*H1, 128), cols 0..C-1 = W3^T
        b3 = p_ref[rb3:rb3 + 1, :]                # (1, 128)

        # conv1 + relu, conv2 + relu, linear head -- three serial MXU dots, no epilogue.
        h = jnp.maximum(jnp.dot(x, m1, preferred_element_type=jnp.float32) + b1, 0.0)
        h = jnp.maximum(jnp.dot(h, m2, preferred_element_type=jnp.float32) + b2, 0.0)
        o_ref[...] = jnp.dot(h, w3, preferred_element_type=jnp.float32) + b3

    return kernel


def pack_params(a_hat, w1, b1, w2, b2, w3, b3,
                num_feat, num_hidden, num_hidden1, num_classes):
    """One-time packing of Kronecker-collapsed constants into a single (R, 128) slab."""
    F, H, H1, C = num_feat, num_hidden, num_hidden1, num_classes
    nf, nh, nh1 = N_NODES * F, N_NODES * H, N_NODES * H1
    offs, total_rows = _layout(nf, nh, nh1)

    # Row-major flatten identity:  vec_r(A_hat @ X @ W) = vec_r(X) @ kron(A_hat^T, W).
    m1 = jnp.kron(a_hat.T, w1).astype(jnp.float32)      # (N*F, N*H)
    m2 = jnp.kron(a_hat.T, w2).astype(jnp.float32)      # (N*H, N*H1)

    slab = jnp.zeros((total_rows, LANES), jnp.float32)
    slab = slab.at[offs["m1"]:offs["m1"] + nf, 0:nh].set(m1)
    slab = slab.at[offs["b1"], 0:nh].set(jnp.tile(b1, N_NODES))
    slab = slab.at[offs["m2"]:offs["m2"] + nh, 0:nh1].set(m2)
    slab = slab.at[offs["b2"], 0:nh1].set(jnp.tile(b2, N_NODES))
    slab = slab.at[offs["w3"]:offs["w3"] + nh1, 0:C].set(w3.T)
    slab = slab.at[offs["b3"], 0:C].set(b3)
    return slab


def make_gcn_forward(num_feat, num_hidden, num_hidden1, num_classes):
    F, H, H1, C = num_feat, num_hidden, num_hidden1, num_classes
    nf, nh, nh1 = N_NODES * F, N_NODES * H, N_NODES * H1
    assert nh <= LANES and nh1 <= LANES and C <= LANES
    offs, total_rows = _layout(nf, nh, nh1)
    kernel = _make_kernel(nf, nh, nh1, offs)

    @jax.jit
    def forward_batch(x, param_slab):
        """x: (B, N_NODES, F) -> logits (B, C). Batch tiled over a parallel grid axis."""
        B = x.shape[0]
        b_pad = _rup(B, BLOCK_B)
        flat = x.reshape(B, nf)                       # free, contiguous reshape
        if b_pad != B:
            flat = jnp.pad(flat, ((0, b_pad - B), (0, 0)))
        out = pl.pallas_call(
            kernel,
            out_shape=jax.ShapeDtypeStruct((b_pad, LANES), jnp.float32),
            grid_spec=pltpu.PrefetchScalarGridSpec(
                num_scalar_prefetch=0,
                grid=(b_pad // BLOCK_B,),
                in_specs=[
                    pl.BlockSpec((BLOCK_B, nf), lambda i: (i, 0)),
                    # Grid-invariant slab: block 0 always -> DMA'd once, stays resident.
                    pl.BlockSpec((total_rows, LANES), lambda i: (0, 0)),
                ],
                out_specs=pl.BlockSpec((BLOCK_B, LANES), lambda i: (i, 0)),
            ),
            compiler_params=pltpu.CompilerParams(
                dimension_semantics=("parallel",)),   # v7x: shard batch across 2 TCs
        )(flat, param_slab)
        return out[:B, :C]

    @jax.jit
    def forward(x, param_slab):
        """Single-graph forward matching the PyTorch module: x is (N_NODES, F)."""
        return forward_batch(x[None], param_slab)[0]

    return forward, forward_batch


def build_normalized_adjacency():
    """Dense A_hat = D_in^{-1/2} A D_out^{-1/2} for the fixed 5-node graph (done once)."""
    src = jnp.array([0, 0, 0, 0, 1, 2, 3, 4], dtype=jnp.int32)
    dst = jnp.array([2, 1, 3, 4, 0, 0, 0, 0], dtype=jnp.int32)
    a = jnp.zeros((N_NODES, N_NODES), jnp.float32).at[dst, src].add(1.0)
    out_deg = jnp.maximum(a.sum(axis=0), 1.0)   # out-degree of source nodes
    in_deg = jnp.maximum(a.sum(axis=1), 1.0)    # in-degree of destination nodes
    return (1.0 / jnp.sqrt(in_deg))[:, None] * a * (1.0 / jnp.sqrt(out_deg))[None, :]


def reference_forward(a_hat, x, w1, b1, w2, b2, w3, b3):
    """Pure-JAX reference of the same math (sanity check)."""
    h = jnp.maximum(a_hat @ (x @ w1) + b1, 0.0)
    h = jnp.maximum(a_hat @ (h @ w2) + b2, 0.0)
    return w3 @ h.reshape(-1) + b3


if __name__ == "__main__":
    num_feat, num_hidden, num_hidden1, num_classes = 8, 16, 16, 4
    batch = 32

    key = jax.random.PRNGKey(0)
    k_x, k_w1, k_b1, k_w2, k_b2, k_w3, k_b3, k_xb = jax.random.split(key, 8)

    x = jax.random.normal(k_x, (N_NODES, num_feat), jnp.float32)

    # GraphConv: weight (in, out), bias (out,);  Linear: weight (C, 5*H1), bias (C,).
    w1 = jax.random.normal(k_w1, (num_feat, num_hidden), jnp.float32) * 0.1
    b1 = jax.random.normal(k_b1, (num_hidden,), jnp.float32) * 0.1
    w2 = jax.random.normal(k_w2, (num_hidden, num_hidden1), jnp.float32) * 0.1
    b2 = jax.random.normal(k_b2, (num_hidden1,), jnp.float32) * 0.1
    w3 = jax.random.normal(k_w3, (num_classes, N_NODES * num_hidden1), jnp.float32) * 0.1
    b3 = jax.random.normal(k_b3, (num_classes,), jnp.float32) * 0.1

    # One-time constant prep (hoisted out of the per-forward path).
    a_hat = build_normalized_adjacency()
    param_slab = jax.block_until_ready(
        pack_params(a_hat, w1, b1, w2, b2, w3, b3,
                    num_feat, num_hidden, num_hidden1, num_classes))

    forward, forward_batch = make_gcn_forward(
        num_feat, num_hidden, num_hidden1, num_classes)

    # Single-graph forward (module semantics).
    out = jax.block_until_ready(forward(x, param_slab))
    ref = reference_forward(a_hat, x, w1, b1, w2, b2, w3, b3)
    assert out.shape == (num_classes,)
    assert jnp.allclose(out, ref, atol=1e-3, rtol=1e-3), (out, ref)

    # Batched forwards amortizing the slab DMA and launch overhead.
    xb = jax.random.normal(k_xb, (batch, N_NODES, num_feat), jnp.float32)
    outb = jax.block_until_ready(forward_batch(xb, param_slab))
    refb = jax.vmap(lambda xi: reference_forward(a_hat, xi, w1, b1, w2, b2, w3, b3))(xb)
    assert outb.shape == (batch, num_classes)
    assert jnp.allclose(outb, refb, atol=1e-3, rtol=1e-3), (outb, refb)

    print("KERNEL_OK")
</pallas_src>

<mosaic_0001>
module attributes {stable_mosaic.version = 11 : i64} {
  func.func @kernel(%arg0: i32, %arg1: memref<8x40xf32, #tpu.memory_space<vmem>>, %arg2: memref<224x128xf32, #tpu.memory_space<vmem>>, %arg3: memref<8x128xf32, #tpu.memory_space<vmem>>) attributes {dimension_semantics = [#tpu.dimension_semantics<parallel>], iteration_bounds = array<i64: 1>, scalar_prefetch = 0 : i64, scratch_operands = 0 : i64, tpu.core_type = #tpu.core_type<tc>, window_params = [{transform_indices = @transform_0, window_bounds = array<i64: 8, 40>}, {pipeline_mode = #tpu.pipeline_mode<synchronous>, transform_indices = @transform_1, window_bounds = array<i64: 224, 128>}, {transform_indices = @transform_2, window_bounds = array<i64: 8, 128>}]} {
    %c0 = arith.constant 0 : index
    %c0_0 = arith.constant 0 : index
    %0 = vector.load %arg1[%c0, %c0_0] : memref<8x40xf32, #tpu.memory_space<vmem>>, vector<8x40xf32>
    %c0_1 = arith.constant 0 : index
    %c0_2 = arith.constant 0 : index
    %1 = vector.load %arg2[%c0_1, %c0_2] : memref<224x128xf32, #tpu.memory_space<vmem>>, vector<40x80xf32>
    %c40 = arith.constant 40 : index
    %c0_3 = arith.constant 0 : index
    %2 = vector.load %arg2[%c40, %c0_3] : memref<224x128xf32, #tpu.memory_space<vmem>>, vector<1x80xf32>
    %c48 = arith.constant 48 : index
    %c0_4 = arith.constant 0 : index
    %3 = vector.load %arg2[%c48, %c0_4] : memref<224x128xf32, #tpu.memory_space<vmem>>, vector<80x80xf32>
    %c128 = arith.constant 128 : index
    %c0_5 = arith.constant 0 : index
    %4 = vector.load %arg2[%c128, %c0_5] : memref<224x128xf32, #tpu.memory_space<vmem>>, vector<1x80xf32>
    %c136 = arith.constant 136 : index
    %c0_6 = arith.constant 0 : index
    %5 = vector.load %arg2[%c136, %c0_6] : memref<224x128xf32, #tpu.memory_space<vmem>>, vector<80x128xf32>
    %c216 = arith.constant 216 : index
    %c0_7 = arith.constant 0 : index
    %6 = vector.load %arg2[%c216, %c0_7] : memref<224x128xf32, #tpu.memory_space<vmem>>, vector<1x128xf32>
    %cst = arith.constant dense<0.000000e+00> : vector<8x80xf32>
    %7 = tpu.matmul %0, %1, %cst {dimension_numbers = #tpu.dot_dimension_numbers<[1], [0], [0], [1], [0, 0, 1, 1], [], []>} : vector<8x40xf32>, vector<40x80xf32>, vector<8x80xf32> -> vector<8x80xf32>
    %8 = vector.broadcast %2 : vector<1x80xf32> to vector<8x80xf32>
    %9 = arith.addf %7, %8 : vector<8x80xf32>
    %cst_8 = arith.constant 0.000000e+00 : f32
    %10 = vector.broadcast %cst_8 : f32 to vector<8x80xf32>
    %11 = arith.maximumf %9, %10 : vector<8x80xf32>
    %cst_9 = arith.constant dense<0.000000e+00> : vector<8x80xf32>
    %12 = tpu.matmul %11, %3, %cst_9 {dimension_numbers = #tpu.dot_dimension_numbers<[1], [0], [0], [1], [0, 0, 1, 1], [], []>} : vector<8x80xf32>, vector<80x80xf32>, vector<8x80xf32> -> vector<8x80xf32>
    %13 = vector.broadcast %4 : vector<1x80xf32> to vector<8x80xf32>
    %14 = arith.addf %12, %13 : vector<8x80xf32>
    %cst_10 = arith.constant 0.000000e+00 : f32
    %15 = vector.broadcast %cst_10 : f32 to vector<8x80xf32>
    %16 = arith.maximumf %14, %15 : vector<8x80xf32>
    %cst_11 = arith.constant dense<0.000000e+00> : vector<8x128xf32>
    %17 = tpu.matmul %16, %5, %cst_11 {dimension_numbers = #tpu.dot_dimension_numbers<[1], [0], [0], [1], [0, 0, 1, 1], [], []>} : vector<8x80xf32>, vector<80x128xf32>, vector<8x128xf32> -> vector<8x128xf32>
    %18 = vector.broadcast %6 : vector<1x128xf32> to vector<8x128xf32>
    %19 = arith.addf %17, %18 : vector<8x128xf32>
    %c0_12 = arith.constant 0 : index
    %c0_13 = arith.constant 0 : index
    %20 = vector.load %arg3[%c0_12, %c0_13] : memref<8x128xf32, #tpu.memory_space<vmem>>, vector<8x128xf32>
    tpu.vector_store %arg3[%c0_12, %c0_13], %19 {strides = array<i32>} : memref<8x128xf32, #tpu.memory_space<vmem>>, vector<8x128xf32>,
    return
  }
  func.func @transform_0(%arg0: i32) -> (i32, i32) {
    %c0_i32 = arith.constant 0 : i32
    %c0_i32_0 = arith.constant 0 : i32
    return %arg0, %c0_i32 : i32, i32
  }
  func.func @transform_1(%arg0: i32) -> (i32, i32) {
    %c0_i32 = arith.constant 0 : i32
    %c0_i32_0 = arith.constant 0 : i32
    %c0_i32_1 = arith.constant 0 : i32
    return %c0_i32, %c0_i32_0 : i32, i32
  }
  func.func @transform_2(%arg0: i32) -> (i32, i32) {
    %c0_i32 = arith.constant 0 : i32
    %c0_i32_0 = arith.constant 0 : i32
    return %arg0, %c0_i32 : i32, i32
  }
}

</mosaic_0001>

<bundles_post_ra>
// kernel: forward_batch.1
= control target key start
LH: loop header
LB: loop body
LE: loop exit
PB: predicated region body
PF: predicated region fallthrough
CT: control target
= control target key end

     0   :  { %7 = vsyncpa [#allocation3], 0  ;;  %s454_s9 = smov [#allocation2]   ;;  %s508_s0 = inlined_call_operand.vmem [shape: f32[8,40], index: 0, kind: input, shape index: {}]   ;;  %s509_s1 = inlined_call_operand.hbm [shape: f32[224,128], index: 1, kind: input, shape index: {}]   ;;  %s510_s2 = inlined_call_operand.vmem [shape: f32[8,128], index: 2, kind: output, shape index: {}]  }
   0x1   :  { %s15_s10 = sshll.u32 %s454_s9, 4  ;;  %s430_s13 = scalar_lea.hbm %s509_s1, 3584  ;;  %s16_s10 = int_to_ptr.vmem [resolvable:$true] %s15_s10 }
   0x2   :  { %p431_p0 = scmp.ne.s32.totalorder %s509_s1, %s430_s13  ;;  %p434_p1 = scmp.lt.u32.totalorder %s430_s13, %s509_s1 }
   0x4   :  { %p436_p2 = pnand %p434_p1, %p431_p0 }
   0x6   :  { %439 = shalt.err (!%p436_p2)
}
   0x7   :  { %s440_s18 = scalar_lea.vmem %s16_s10, 3584  ;;  %p445_p4 = scmp.lt.s32.totalorder %s16_s10, %s16_s10 }
   0x8   :  { %p441_p3 = scmp.ne.s32.totalorder %s16_s10, %s440_s18  ;;  %p446_p5 = scmp.lt.s32.totalorder %s440_s18, %s440_s18 }
   0xa   :  { %p447_p6 = por %p446_p5, %p445_p4 }
   0xc   :  { %p448_p7 = pnand %p447_p6, %p441_p3 }
   0xe   :  { %451 = shalt.err (!%p448_p7)
}
   0xf   :  { %s455_s19 = smov 128   ;;  %s456_s20 = smov 8  }
  0x10   :  { %21 = dma.hbm_to_vmem [thread:$0]  %s509_s1, 3584, %s16_s10, [#allocation3], %s455_s19, %s455_s19, %s456_s20  }
  0x11   :  { %452 = dma.done.wait [#allocation3], 3584  }
  0x12   :  { %453 = vsyncadd [#allocation3], 4294963712  ;;  %v457_v0 = vmov 0.0|0.0   ;;  %vm458_vm0 = vmmov 0   ;;  %v459_v1 = vmov 0.0   ;;  %v26_v2 = vld [vmem:[#allocation2] sm:$0xff] }
  0x13   :  { %388 = vmatprep.subr.bf16.mxu0 %v457_v0  ;;  %339 = vmatprep.mubr.msk.f32.mxu0 %vm458_vm0, %v459_v1  ;;  %v27_v3 = vld [vmem:[#allocation2 + $0x8] sm:$0xff]  ;;  %v28_v4 = vld [vmem:[#allocation2 + $0x10] sm:$0xff]  ;;  %v29_v6 = vld [vmem:[#allocation2 + $0x18] sm:$0xff]  ;;  %vm58_vm1 = vcmask 326656   ;;  %vm137_vm2 = vcmask 654336  }
  0x14   :  { %394 = vmatprep.subr.bf16.mxu1 %v457_v0  ;;  %362 = vmatprep.mubr.msk.f32.mxu1 %vm458_vm0, %v459_v1  ;;  %v389_v5 = vpack.c.bf16 %v27_v3, %v26_v2  ;;  %v32_v7 = vld [vmem:[#allocation2 + $0x30] sm:$0xff]  ;;  %v33_v8 = vld [vmem:[#allocation2 + $0x38] sm:$0xff]  ;;  %v34_v9 = vld [vmem:[#allocation2 + $0x40] sm:$0xff]  ;;  %v392_v10 = vpack.c.bf16 %v29_v6, %v28_v4 }
  0x15   :  { %v395_v11 = vpack.c.bf16 %v33_v8, %v32_v7  ;;  %v35_v12 = vld [vmem:[#allocation2 + $0x48] sm:$0xff]  ;;  %v36_v14 = vld [vmem:[#allocation2 + $0x50] sm:$0xff]  ;;  %v37_v15 = vld [vmem:[#allocation2 + $0x58] sm:$0xff] }
  0x16   :  { %390 = vmatpush3.bf16.msra.mxu0 %v389_v5  ;;  %v398_v13 = vpack.c.bf16 %v35_v12, %v34_v9  ;;  %v30_v16 = vld [vmem:[#allocation2 + $0x20] sm:$0xff]  ;;  %v401_v18 = vpack.c.bf16 %v37_v15, %v36_v14  ;;  %v39_v20 = vld [vmem:[#allocation2 + $0x68] sm:$0xff]  ;;  %v40_v22 = vld [vmem:[#allocation2 + $0x70] sm:$0xff] }
  0x17   :  { %391 = vmatprep.subr.bf16.mxu0 %v457_v0  ;;  %396 = vmatpush3.bf16.msra.mxu1 %v395_v11  ;;  %v25_v17 = vld [vmem:[%s508_s0] sm:$0xff]  ;;  %v41_v23 = vld [vmem:[#allocation2 + $0x78] sm:$0xff]  ;;  %v43_v25 = vld [vmem:[#allocation2 + $0x88] sm:$0xff] }
  0x18   :  { %397 = vmatprep.subr.bf16.mxu1 %v457_v0  ;;  %v38_v19 = vld [vmem:[#allocation2 + $0x60] sm:$0xff]  ;;  %v407_v24 = vpack.c.bf16 %v41_v23, %v40_v22  ;;  %v44_v26 = vld [vmem:[#allocation2 + $0x90] sm:$0xff]  ;;  %v45_v27 = vld [vmem:[#allocation2 + $0x98] sm:$0xff] }
  0x19   :  { %v404_v21 = vpack.c.bf16 %v39_v20, %v38_v19  ;;  %v410_v28 = vpack.c.bf16 %v44_v26, %v43_v25  ;;  %v46_v29 = vld [vmem:[#allocation2 + $0xa0] sm:$0xff]  ;;  %v47_v31 = vld [vmem:[#allocation2 + $0xa8] sm:$0xff]  ;;  %v48_v32 = vld [vmem:[#allocation2 + $0xb0] sm:$0xff] }
  0x1a   :  { %393 = vmatpush3.bf16.msra.mxu0 %v392_v10  ;;  %v413_v30 = vpack.c.bf16 %v46_v29, %v45_v27  ;;  %v416_v33 = vpack.c.bf16 %v48_v32, %v47_v31  ;;  %v49_v34 = vld [vmem:[#allocation2 + $0xb8] sm:$0xff]  ;;  %v50_v35 = vld [vmem:[#allocation2 + $0xc0] sm:$0xff]  ;;  %v295_v37 = vld [vmem:[#allocation2 + $0x28] ss:$0 sm:$0xff] }
  0x1b   :  { %337 = vmatprep.subr.mxu0 %v459_v1  ;;  %399 = vmatpush3.bf16.msra.mxu1 %v398_v13  ;;  %v419_v36 = vpack.c.bf16 %v50_v35, %v49_v34  ;;  %v51_v42 = vld [vmem:[#allocation2 + $0xc8] sm:$0xff]  ;;  %v52_v43 = vld [vmem:[#allocation2 + $0xd0] sm:$0xff]  ;;  %v297_v45 = vld [vmem:[#allocation2 + $0x80] ss:$0 sm:$0xff] }
  0x1c   :  { %400 = vmatprep.subr.bf16.mxu1 %v457_v0  ;;  %v422_v44 = vpack.c.bf16 %v52_v43, %v51_v42  ;;  %v299_v50 = vld [vmem:[#allocation2 + $0xd8] ss:$0 sm:$0xff] }
  0x1e   :  { %338 = vmatpush3.msra.mxu0 %v30_v16 }
  0x1f   :  { %340 = vmatmul.mubr.msk.f32.vlgmr.msra.gmra.mrb[0].mxu0 %vm58_vm1, %v25_v17  ;;  %409 = vmatprep.subr.bf16.mxu0 %v457_v0 }
  0x20   :  { %402 = vmatpush3.bf16.msra.mxu1 %v401_v18  ;;  %385 = vmatprep.mubr.msk.f32.mxu0 %vm458_vm0, %v459_v1 }
  0x21   :  { %403 = vmatprep.subr.bf16.mxu1 %v457_v0  ;;  %411 = vmatpush3.bf16.msra.mxu0 %v410_v28 }
  0x22   :  { %412 = vmatprep.subr.bf16.mxu0 %v457_v0 }
  0x24   :  { %405 = vmatpush3.bf16.msra.mxu1 %v404_v21 }
  0x25   :  { %406 = vmatprep.subr.bf16.mxu1 %v457_v0  ;;  %414 = vmatpush3.bf16.msra.mxu0 %v413_v30 }
  0x26   :  { %415 = vmatprep.subr.bf16.mxu0 %v457_v0 }
  0x28   :  { %408 = vmatpush3.bf16.msra.mxu1 %v407_v24 }
  0x29   :  { %417 = vmatpush3.bf16.msra.mxu0 %v416_v33 }
  0x2a   :  { %418 = vmatprep.subr.bf16.mxu0 %v457_v0 }
  0x2d   :  { %420 = vmatpush3.bf16.msra.mxu0 %v419_v36 }
  0x2e   :  { %421 = vmatprep.subr.bf16.mxu0 %v457_v0 }
  0x31   :  { %423 = vmatpush3.bf16.msra.mxu0 %v422_v44 }
  0xf2   :  { %v128_v38 = vpop.f32.mrb[0].mxu0 }
  0xf3   :  { %v129_v39 = vadd.f32 %v295_v37, %v128_v38  ;;  %v341_v40 = vpop.f32.mrb[1].mxu0 }
  0xf5   :  { %v132_v41 = vmax.f32 %v129_v39, 0.0 }
  0xf7   :  { %363 = vmatmul.mubr.msk.f32.vlgmr.msra.gmra.mrb[0].mxu1 %vm137_vm2, %v132_v41 }
 0x1ca   :  { %v207_v46 = vpop.f32.mrb[0].mxu1 }
 0x1cb   :  { %v208_v47 = vadd.f32 %v297_v45, %v207_v46  ;;  %v364_v48 = vpop.f32.mrb[1].mxu1 }
 0x1cd   :  { %v211_v49 = vmax.f32 %v208_v47, 0.0 }
 0x1cf   :  { %386 = vmatmul.mubr.msk.f32.vlgmr.msra.gmra.mrb[2].mxu0 %vm137_vm2, %v211_v49 }
 0x2a2   :  { %v285_v51 = vpop.f32.mrb[2].mxu0 }
 0x2a3   :  { %v286_v52 = vadd.f32 %v299_v50, %v285_v51  ;;  %v387_v53 = vpop.f32.mrb[3].mxu0 }
 0x2a5   :  { %289 = vst [vmem:[%s510_s2] sm:$0xff] %v286_v52 }
 0x2a6   :  { %294 = vsyncpa [#allocation3], 1 }

</bundles_post_ra>
